<compile_context>
chip_gen: v6e
topology: v6e:2x2x1
jax: 0.10.0
libtpu: 0.0.40
codegen_flags: <defaults>
</compile_context>

<pallas_src>
import functools

import jax
import jax.numpy as jnp
from jax import lax
from jax.experimental import pallas as pl
from jax.experimental.pallas import tpu as pltpu

BN_EPS = 1e-5
_LANE = 128
_VMEM_BUDGET = 40 * 1024 * 1024    # conservative: leaves headroom in v7x 64 MiB
_VMEM_LIMIT = 48 * 1024 * 1024


def _round_up(x, m):
    return (x + m - 1) // m * m


def _choose_tile_m(m, k, c_pad):
    """Largest 128/256-aligned M tile whose double-buffered blocks fit VMEM."""
    for t in (2048, 1024, 512, 256, 128):
        if t > max(m, 128):
            continue
        pass1 = 2 * (t * k * 2 + t * c_pad * 4) + k * c_pad * 2 + 2 * c_pad * 4
        pass2 = 2 * (3 * t * c_pad * 4) + 2 * 2 * c_pad * 4
        if max(pass1, pass2) <= _VMEM_BUDGET:
            return t
    return 128


# ----------------------------------------------------------------------------
# Pass 1: tiled matmul (bf16 -> f32) + per-channel partial sum / sum-of-squares
# ----------------------------------------------------------------------------
def _conv_stats_kernel(p_ref, w_ref, y_ref, sum_ref, sq_ref, s_acc, q_acc):
    i = pl.program_id(0)

    @pl.when(i == 0)
    def _init():
        s_acc[...] = jnp.zeros_like(s_acc)
        q_acc[...] = jnp.zeros_like(q_acc)

    y = jnp.dot(p_ref[...], w_ref[...], preferred_element_type=jnp.float32)
    y_ref[...] = y
    s_acc[...] += jnp.sum(y, axis=0, keepdims=True)
    q_acc[...] += jnp.sum(y * y, axis=0, keepdims=True)

    @pl.when(i == pl.num_programs(0) - 1)
    def _fin():
        sum_ref[...] = s_acc[...]
        sq_ref[...] = q_acc[...]


# ----------------------------------------------------------------------------
# Pass 2: folded BN (scale/bias) + optional residual + optional ReLU
# ----------------------------------------------------------------------------
def _bn_act_kernel(apply_relu, has_residual, *refs):
    if has_residual:
        y_ref, s_ref, b_ref, r_ref, o_ref = refs
    else:
        y_ref, s_ref, b_ref, o_ref = refs
    out = y_ref[...] * s_ref[...] + b_ref[...]
    if has_residual:
        out = out + r_ref[...]
    if apply_relu:
        out = jnp.maximum(out, 0.0)
    o_ref[...] = out.astype(o_ref.dtype)


def conv_bn_act(patches, w2d, gamma, beta, *, residual=None, apply_relu=True,
                out_dtype=jnp.float32):
    """conv-as-matmul + training-mode BatchNorm (+ residual) (+ ReLU)."""
    M, K = patches.shape
    C = w2d.shape[1]
    C_pad = _round_up(C, _LANE)
    tile_m = _choose_tile_m(M, K, C_pad)
    M_pad = _round_up(M, tile_m)
    n_tiles = M_pad // tile_m

    # bf16 MXU operands; zero padding keeps BN partial sums exact.
    p = jnp.pad(patches.astype(jnp.bfloat16), ((0, M_pad - M), (0, 0)))
    w = jnp.pad(w2d, ((0, 0), (0, C_pad - C))).astype(jnp.bfloat16)
    g = jnp.pad(gamma.astype(jnp.float32), (0, C_pad - C)).reshape(1, C_pad)
    b = jnp.pad(beta.astype(jnp.float32), (0, C_pad - C)).reshape(1, C_pad)

    flops = 2 * M_pad * K * C_pad
    bytes_accessed = M_pad * K * 2 + K * C_pad * 2 + M_pad * C_pad * 4

    y, s_sum, s_sq = pl.pallas_call(
        _conv_stats_kernel,
        out_shape=(
            jax.ShapeDtypeStruct((M_pad, C_pad), jnp.float32),
            jax.ShapeDtypeStruct((1, C_pad), jnp.float32),
            jax.ShapeDtypeStruct((1, C_pad), jnp.float32),
        ),
        grid=(n_tiles,),
        in_specs=[
            pl.BlockSpec((tile_m, K), lambda i: (i, 0)),
            pl.BlockSpec((K, C_pad), lambda i: (0, 0)),     # resident weight
        ],
        out_specs=(
            pl.BlockSpec((tile_m, C_pad), lambda i: (i, 0)),
            pl.BlockSpec((1, C_pad), lambda i: (0, 0)),
            pl.BlockSpec((1, C_pad), lambda i: (0, 0)),
        ),
        scratch_shapes=[
            pltpu.VMEM((1, C_pad), jnp.float32),
            pltpu.VMEM((1, C_pad), jnp.float32),
        ],
        compiler_params=pltpu.CompilerParams(
            dimension_semantics=("arbitrary",),   # BN stats reduce across tiles
            vmem_limit_bytes=_VMEM_LIMIT,
        ),
        cost_estimate=pl.CostEstimate(
            flops=flops, transcendentals=0, bytes_accessed=bytes_accessed),
    )(p, w)

    # Fold BN into one multiply-add (statistics over the M real rows only;
    # padded rows contribute exact zeros to the partial sums).
    inv_m = 1.0 / float(M)
    mean = s_sum * inv_m
    var = jnp.maximum(s_sq * inv_m - mean * mean, 0.0)
    scale = g * lax.rsqrt(var + BN_EPS)
    bias = b - mean * scale

    has_residual = residual is not None
    args = [y, scale, bias]
    in_specs = [
        pl.BlockSpec((tile_m, C_pad), lambda i: (i, 0)),
        pl.BlockSpec((1, C_pad), lambda i: (0, 0)),
        pl.BlockSpec((1, C_pad), lambda i: (0, 0)),
    ]
    if has_residual:
        r = jnp.pad(residual.astype(jnp.float32),
                    ((0, M_pad - M), (0, C_pad - residual.shape[1])))
        args.append(r)
        in_specs.append(pl.BlockSpec((tile_m, C_pad), lambda i: (i, 0)))

    out = pl.pallas_call(
        functools.partial(_bn_act_kernel, apply_relu, has_residual),
        out_shape=jax.ShapeDtypeStruct((M_pad, C_pad), out_dtype),
        grid=(n_tiles,),
        in_specs=in_specs,
        out_specs=pl.BlockSpec((tile_m, C_pad), lambda i: (i, 0)),
        compiler_params=pltpu.CompilerParams(
            dimension_semantics=("parallel",),    # independent tiles: megacore
            vmem_limit_bytes=_VMEM_LIMIT,
        ),
    )(*args)

    return out[:M, :C]


# ----------------------------------------------------------------------------
# Glue: im2col patch extraction (plain JAX, bf16 operand)
# ----------------------------------------------------------------------------
def im2col(x_nhwc, kh, kw, stride, pad):
    N, H, W, C = x_nhwc.shape
    xp = jnp.pad(x_nhwc, ((0, 0), (pad, pad), (pad, pad), (0, 0)))
    Ho = (H + 2 * pad - kh) // stride + 1
    Wo = (W + 2 * pad - kw) // stride + 1
    cols = []
    for i in range(kh):
        for j in range(kw):
            cols.append(xp[:, i:i + stride * Ho:stride, j:j + stride * Wo:stride, :])
    p = jnp.stack(cols, axis=3)                    # (N, Ho, Wo, kh*kw, C)
    return p.reshape(N * Ho * Wo, kh * kw * C), (N, Ho, Wo)


# ----------------------------------------------------------------------------
# Parameters (deterministic, synthetic)
# ----------------------------------------------------------------------------
def init_params(key, in_planes, planes, stride):
    ks = jax.random.split(key, 9)
    p = {
        "w1": jax.random.normal(ks[0], (3, 3, in_planes, planes), jnp.float32) * 0.1,
        "g1": 1.0 + 0.1 * jax.random.normal(ks[1], (planes,), jnp.float32),
        "b1": 0.1 * jax.random.normal(ks[2], (planes,), jnp.float32),
        "w2": jax.random.normal(ks[3], (3, 3, planes, planes), jnp.float32) * 0.1,
        "g2": 1.0 + 0.1 * jax.random.normal(ks[4], (planes,), jnp.float32),
        "b2": 0.1 * jax.random.normal(ks[5], (planes,), jnp.float32),
    }
    if stride != 1 or in_planes != planes:
        p["ws"] = jax.random.normal(ks[6], (1, 1, in_planes, planes), jnp.float32) * 0.1
        p["gs"] = 1.0 + 0.1 * jax.random.normal(ks[7], (planes,), jnp.float32)
        p["bs"] = 0.1 * jax.random.normal(ks[8], (planes,), jnp.float32)
    return p


# ----------------------------------------------------------------------------
# BasicBlock forward (Pallas)
# ----------------------------------------------------------------------------
def basic_block_forward(x_nchw, params, stride):
    # TODO(synk): keep activations NHWC end-to-end in the surrounding model to
    # drop these two full HBM-roundtrip transposes.
    x = jnp.transpose(x_nchw, (0, 2, 3, 1)).astype(jnp.float32)      # NHWC
    N, H, W, Cin = x.shape
    planes = params["w1"].shape[-1]
    x_bf16 = x.astype(jnp.bfloat16)          # conv (MXU) operand

    # conv1 (3x3, stride) + bn1 + relu ; output kept bf16 (it only feeds the
    # next conv's bf16 matmul).
    p1, (n, ho, wo) = im2col(x_bf16, 3, 3, stride, 1)
    w1 = params["w1"].reshape(9 * Cin, planes)
    out1 = conv_bn_act(p1, w1, params["g1"], params["b1"],
                       apply_relu=True, out_dtype=jnp.bfloat16)
    out1_nhwc = out1.reshape(n, ho, wo, planes)

    # shortcut branch (residual) kept in f32
    if "ws" in params:
        ps, _ = im2col(x_bf16, 1, 1, stride, 0)
        ws = params["ws"].reshape(Cin, planes)
        shortcut = conv_bn_act(ps, ws, params["gs"], params["bs"],
                               apply_relu=False, out_dtype=jnp.float32)
    else:
        shortcut = x.reshape(N * H * W, Cin)                         # identity

    # conv2 (3x3, stride 1) + bn2 + residual add + relu
    p2, _ = im2col(out1_nhwc, 3, 3, 1, 1)
    w2 = params["w2"].reshape(9 * planes, planes)
    out2 = conv_bn_act(p2, w2, params["g2"], params["b2"],
                       residual=shortcut, apply_relu=True,
                       out_dtype=jnp.float32)

    out_nhwc = out2.reshape(n, ho, wo, planes)
    return jnp.transpose(out_nhwc, (0, 3, 1, 2))                     # NCHW


# ----------------------------------------------------------------------------
# Pure-JAX reference (for validation only)
# ----------------------------------------------------------------------------
def _ref_bn(x_nchw, gamma, beta):
    mean = x_nchw.mean(axis=(0, 2, 3), keepdims=True)
    var = ((x_nchw - mean) ** 2).mean(axis=(0, 2, 3), keepdims=True)
    return ((x_nchw - mean) * lax.rsqrt(var + BN_EPS) * gamma[None, :, None, None]
            + beta[None, :, None, None])


def _ref_conv(x_nchw, w_hwio, stride, pad, quantize):
    if quantize:  # mimic the kernel's bf16 MXU inputs (f32 accumulation)
        x_nchw = x_nchw.astype(jnp.bfloat16).astype(jnp.float32)
        w_hwio = w_hwio.astype(jnp.bfloat16).astype(jnp.float32)
    return lax.conv_general_dilated(
        x_nchw, w_hwio, (stride, stride), ((pad, pad), (pad, pad)),
        dimension_numbers=("NCHW", "HWIO", "NCHW"))


def ref_forward(x_nchw, params, stride, quantize=False):
    out = _ref_conv(x_nchw, params["w1"], stride, 1, quantize)
    out = jax.nn.relu(_ref_bn(out, params["g1"], params["b1"]))
    out = _ref_conv(out, params["w2"], 1, 1, quantize)
    out = _ref_bn(out, params["g2"], params["b2"])
    if "ws" in params:
        sc = _ref_conv(x_nchw, params["ws"], stride, 0, quantize)
        sc = _ref_bn(sc, params["gs"], params["bs"])
    else:
        sc = x_nchw
    return jax.nn.relu(out + sc)


# ----------------------------------------------------------------------------
if __name__ == "__main__":
    key = jax.random.PRNGKey(0)
    kx, kp = jax.random.split(key)

    batch, in_planes, planes, spatial, stride = 2, 4, 8, 16, 2
    x = jax.random.normal(kx, (batch, in_planes, spatial, spatial), jnp.float32)
    params = init_params(kp, in_planes, planes, stride)

    out = jax.block_until_ready(basic_block_forward(x, params, stride))
    assert out.shape == (batch, planes, spatial // stride, spatial // stride)

    # Tight check vs a reference that applies the same bf16 input rounding the
    # kernel's MXU path uses (isolates the Pallas algorithm itself).
    ref_q = jax.block_until_ready(ref_forward(x, params, stride, quantize=True))
    assert jnp.allclose(out, ref_q, atol=5e-3, rtol=5e-3), \
        "mismatch vs bf16-input JAX reference"

    # Sanity check vs the exact f32 module semantics (tolerance covers the
    # documented bf16 rounding of the conv operands).
    ref = jax.block_until_ready(ref_forward(x, params, stride, quantize=False))
    assert jnp.allclose(out, ref, atol=3e-2, rtol=3e-2), \
        "mismatch vs f32 JAX reference"

    print("KERNEL_OK")
</pallas_src>

<mosaic_0001>
module attributes {stable_mosaic.version = 11 : i64} {
  func.func @_conv_stats_kernel(%arg0: i32, %arg1: memref<128x36xbf16, #tpu.memory_space<vmem>>, %arg2: memref<36x128xbf16, #tpu.memory_space<vmem>>, %arg3: memref<128x128xf32, #tpu.memory_space<vmem>>, %arg4: memref<1x128xf32, #tpu.memory_space<vmem>>, %arg5: memref<1x128xf32, #tpu.memory_space<vmem>>, %arg6: memref<1x128xf32, #tpu.memory_space<vmem>>, %arg7: memref<1x128xf32, #tpu.memory_space<vmem>>) attributes {dimension_semantics = [#tpu.dimension_semantics<arbitrary>], iteration_bounds = array<i64: 1>, scalar_prefetch = 0 : i64, scratch_operands = 2 : i64, tpu.core_type = #tpu.core_type<tc>, window_params = [{transform_indices = @transform_0, window_bounds = array<i64: 128, 36>}, {pipeline_mode = #tpu.pipeline_mode<synchronous>, transform_indices = @transform_1, window_bounds = array<i64: 36, 128>}, {transform_indices = @transform_2, window_bounds = array<i64: 128, 128>}, {pipeline_mode = #tpu.pipeline_mode<synchronous>, transform_indices = @transform_3, window_bounds = array<i64: 1, 128>}, {pipeline_mode = #tpu.pipeline_mode<synchronous>, transform_indices = @transform_4, window_bounds = array<i64: 1, 128>}]} {
    %c0_i32 = arith.constant 0 : i32
    %0 = arith.cmpi eq, %arg0, %c0_i32 : i32
    %1 = arith.extui %0 : i1 to i32
    %c0_i32_0 = arith.constant 0 : i32
    %2 = arith.cmpi ne, %1, %c0_i32_0 : i32
    scf.if %2 {
      %cst_18 = arith.constant 0.000000e+00 : f32
      %21 = vector.broadcast %cst_18 : f32 to vector<1x128xf32>
      %c0_19 = arith.constant 0 : index
      %c0_20 = arith.constant 0 : index
      %22 = vector.load %arg6[%c0_19, %c0_20] : memref<1x128xf32, #tpu.memory_space<vmem>>, vector<1x128xf32>
      tpu.vector_store %arg6[%c0_19, %c0_20], %21 {strides = array<i32>} : memref<1x128xf32, #tpu.memory_space<vmem>>, vector<1x128xf32>,
      %cst_21 = arith.constant 0.000000e+00 : f32
      %23 = vector.broadcast %cst_21 : f32 to vector<1x128xf32>
      %c0_22 = arith.constant 0 : index
      %c0_23 = arith.constant 0 : index
      %24 = vector.load %arg7[%c0_22, %c0_23] : memref<1x128xf32, #tpu.memory_space<vmem>>, vector<1x128xf32>
      tpu.vector_store %arg7[%c0_22, %c0_23], %23 {strides = array<i32>} : memref<1x128xf32, #tpu.memory_space<vmem>>, vector<1x128xf32>,
    } else {
    }
    %c0 = arith.constant 0 : index
    %c0_1 = arith.constant 0 : index
    %3 = vector.load %arg1[%c0, %c0_1] : memref<128x36xbf16, #tpu.memory_space<vmem>>, vector<128x36xbf16>
    %c0_2 = arith.constant 0 : index
    %c0_3 = arith.constant 0 : index
    %4 = vector.load %arg2[%c0_2, %c0_3] : memref<36x128xbf16, #tpu.memory_space<vmem>>, vector<36x128xbf16>
    %cst = arith.constant dense<0.000000e+00> : vector<128x128xf32>
    %5 = tpu.matmul %3, %4, %cst {dimension_numbers = #tpu.dot_dimension_numbers<[1], [0], [0], [1], [0, 0, 1, 1], [], []>} : vector<128x36xbf16>, vector<36x128xbf16>, vector<128x128xf32> -> vector<128x128xf32>
    %c0_4 = arith.constant 0 : index
    %c0_5 = arith.constant 0 : index
    %6 = vector.load %arg3[%c0_4, %c0_5] : memref<128x128xf32, #tpu.memory_space<vmem>>, vector<128x128xf32>
    tpu.vector_store %arg3[%c0_4, %c0_5], %5 {strides = array<i32>} : memref<128x128xf32, #tpu.memory_space<vmem>>, vector<128x128xf32>,
    %c0_6 = arith.constant 0 : index
    %c0_7 = arith.constant 0 : index
    %7 = vector.load %arg6[%c0_6, %c0_7] : memref<1x128xf32, #tpu.memory_space<vmem>>, vector<1x128xf32>
    %cst_8 = arith.constant dense<0.000000e+00> : vector<128xf32>
    %8 = vector.multi_reduction <add>, %5, %cst_8 [0] : vector<128x128xf32> to vector<128xf32>
    %9 = vector.shape_cast %8 : vector<128xf32> to vector<1x128xf32>
    %10 = arith.addf %7, %9 : vector<1x128xf32>
    %c0_9 = arith.constant 0 : index
    %c0_10 = arith.constant 0 : index
    %11 = vector.load %arg6[%c0_9, %c0_10] : memref<1x128xf32, #tpu.memory_space<vmem>>, vector<1x128xf32>
    tpu.vector_store %arg6[%c0_9, %c0_10], %10 {strides = array<i32>} : memref<1x128xf32, #tpu.memory_space<vmem>>, vector<1x128xf32>,
    %c0_11 = arith.constant 0 : index
    %c0_12 = arith.constant 0 : index
    %12 = vector.load %arg7[%c0_11, %c0_12] : memref<1x128xf32, #tpu.memory_space<vmem>>, vector<1x128xf32>
    %13 = arith.mulf %5, %5 : vector<128x128xf32>
    %cst_13 = arith.constant dense<0.000000e+00> : vector<128xf32>
    %14 = vector.multi_reduction <add>, %13, %cst_13 [0] : vector<128x128xf32> to vector<128xf32>
    %15 = vector.shape_cast %14 : vector<128xf32> to vector<1x128xf32>
    %16 = arith.addf %12, %15 : vector<1x128xf32>
    %c0_14 = arith.constant 0 : index
    %c0_15 = arith.constant 0 : index
    %17 = vector.load %arg7[%c0_14, %c0_15] : memref<1x128xf32, #tpu.memory_space<vmem>>, vector<1x128xf32>
    tpu.vector_store %arg7[%c0_14, %c0_15], %16 {strides = array<i32>} : memref<1x128xf32, #tpu.memory_space<vmem>>, vector<1x128xf32>,
    %c0_i32_16 = arith.constant 0 : i32
    %18 = arith.cmpi eq, %arg0, %c0_i32_16 : i32
    %19 = arith.extui %18 : i1 to i32
    %c0_i32_17 = arith.constant 0 : i32
    %20 = arith.cmpi ne, %19, %c0_i32_17 : i32
    scf.if %20 {
      %c0_18 = arith.constant 0 : index
      %c0_19 = arith.constant 0 : index
      %21 = vector.load %arg6[%c0_18, %c0_19] : memref<1x128xf32, #tpu.memory_space<vmem>>, vector<1x128xf32>
      %c0_20 = arith.constant 0 : index
      %c0_21 = arith.constant 0 : index
      %22 = vector.load %arg4[%c0_20, %c0_21] : memref<1x128xf32, #tpu.memory_space<vmem>>, vector<1x128xf32>
      tpu.vector_store %arg4[%c0_20, %c0_21], %21 {strides = array<i32>} : memref<1x128xf32, #tpu.memory_space<vmem>>, vector<1x128xf32>,
      %c0_22 = arith.constant 0 : index
      %c0_23 = arith.constant 0 : index
      %23 = vector.load %arg7[%c0_22, %c0_23] : memref<1x128xf32, #tpu.memory_space<vmem>>, vector<1x128xf32>
      %c0_24 = arith.constant 0 : index
      %c0_25 = arith.constant 0 : index
      %24 = vector.load %arg5[%c0_24, %c0_25] : memref<1x128xf32, #tpu.memory_space<vmem>>, vector<1x128xf32>
      tpu.vector_store %arg5[%c0_24, %c0_25], %23 {strides = array<i32>} : memref<1x128xf32, #tpu.memory_space<vmem>>, vector<1x128xf32>,
    } else {
    }
    return
  }
  func.func @transform_0(%arg0: i32) -> (i32, i32) {
    %c0_i32 = arith.constant 0 : i32
    %c0_i32_0 = arith.constant 0 : i32
    return %arg0, %c0_i32 : i32, i32
  }
  func.func @transform_1(%arg0: i32) -> (i32, i32) {
    %c0_i32 = arith.constant 0 : i32
    %c0_i32_0 = arith.constant 0 : i32
    %c0_i32_1 = arith.constant 0 : i32
    return %c0_i32, %c0_i32_0 : i32, i32
  }
  func.func @transform_2(%arg0: i32) -> (i32, i32) {
    %c0_i32 = arith.constant 0 : i32
    %c0_i32_0 = arith.constant 0 : i32
    return %arg0, %c0_i32 : i32, i32
  }
  func.func @transform_3(%arg0: i32) -> (i32, i32) {
    %c0_i32 = arith.constant 0 : i32
    %c0_i32_0 = arith.constant 0 : i32
    %c0_i32_1 = arith.constant 0 : i32
    return %c0_i32, %c0_i32_0 : i32, i32
  }
  func.func @transform_4(%arg0: i32) -> (i32, i32) {
    %c0_i32 = arith.constant 0 : i32
    %c0_i32_0 = arith.constant 0 : i32
    %c0_i32_1 = arith.constant 0 : i32
    return %c0_i32, %c0_i32_0 : i32, i32
  }
}

</mosaic_0001>

<bundles_post_ra>
// kernel: tpu_custom_call.1
= control target key start
LH: loop header
LB: loop body
LE: loop exit
PB: predicated region body
PF: predicated region fallthrough
CT: control target
= control target key end

     0   :  { %10 = vsyncpa [#allocation5], 0  ;;  %vm124_vm0 = vcmask 1041408   ;;  %vm99_vm1 = vcmask 293888   ;;  %s601_s0 = inlined_call_operand.vmem [shape: bf16[128,36], index: 0, kind: input, shape index: {}]   ;;  %s602_s1 = inlined_call_operand.vmem [shape: bf16[36,128], index: 1, kind: input, shape index: {}]   ;;  %s603_s2 = inlined_call_operand.hbm [shape: f32[128,128], index: 2, kind: output, shape index: {0}]   ;;  %s604_s3 = inlined_call_operand.hbm [shape: f32[1,128], index: 3, kind: output, shape index: {1}]   ;;  %s605_s4 = inlined_call_operand.hbm [shape: f32[1,128], index: 4, kind: output, shape index: {2}]  }
   0x1   :  { %v421_v0 = vld [vmem:[%s602_s1 + $0x10] ss:$0 sps:$4 sm:$0x33]   ;;  %v422_v1 = vld [vmem:[%s602_s1 + $0x8] sm:$0xff]   ;;  %v424_v3 = vld [vmem:[%s601_s0] sm:$0xff]  }
   0x2   :  { %413 = vmatprep.subr.msk.bf16.mxu0 %vm124_vm0, %v421_v0  ;;  %v126_v2 = vsel %vm124_vm0, %v421_v0, 0  ;;  %414 = vmatprep.subr.msk.bf16.mxu1 %vm124_vm0, %v421_v0  ;;  %v423_v4 = vld [vmem:[%s602_s1] sm:$0xff]   ;;  %v425_v6 = vld [vmem:[%s601_s0 + $0x8] sm:$0xff]   ;;  %v426_v8 = vld [vmem:[%s601_s0 + $0x10] sm:$0xff]  }
   0x3   :  { %386 = vmatpush3.bf16.msra.mxu0 %v126_v2  ;;  %410 = vmatpush3.bf16.msra.mxu1 %v126_v2  ;;  %v428_v5 = vld [vmem:[%s601_s0 + $0x20] sm:$0xff]   ;;  %v429_v7 = vld [vmem:[%s601_s0 + $0x28] sm:$0xff]   ;;  %v430_v9 = vld [vmem:[%s601_s0 + $0x30] sm:$0xff]  }
   0x4   :  { %387 = vmatprep.subr.bf16.mxu0 %v422_v1  ;;  %408 = vmatprep.subr.bf16.mxu1 %v422_v1 }
   0x5   :  { %391 = vmatprep.mubr.msk.bf16.mxu0 %vm99_vm1, %v424_v3  ;;  %399 = vmatprep.mubr.msk.bf16.mxu1 %vm99_vm1, %v428_v5 }
   0x7   :  { %388 = vmatpush3.bf16.msra.mxu0 %v422_v1  ;;  %411 = vmatpush3.bf16.msra.mxu1 %v422_v1 }
   0x8   :  { %389 = vmatprep.subr.bf16.mxu0 %v423_v4  ;;  %409 = vmatprep.subr.bf16.mxu1 %v423_v4 }
   0xb   :  { %390 = vmatpush3.bf16.msra.mxu0 %v423_v4  ;;  %412 = vmatpush3.bf16.msra.mxu1 %v423_v4 }
   0xc   :  { %11 = vsyncpa [#allocation7], 0  ;;  %v427_v10 = vld [vmem:[%s601_s0 + $0x18] sm:$0xff]   ;;  %v496_v12 = vmov 0.0  }
   0xd   :  { %v431_v11 = vld [vmem:[%s601_s0 + $0x38] sm:$0xff]   ;;  %21 = vst [vmem:[#allocation2] sm:$0x1] %v496_v12  ;;  %22 = vst [vmem:[#allocation3] sm:$0x1] %v496_v12  ;;  %s497_s0 = smov [#allocation4]  }
   0xe   :  { %392 = vmatmul.mubr.msk.bf16.vlgmr.msra.gmra.mxu0 %vm99_vm1, %v425_v6  ;;  %400 = vmatmul.mubr.msk.bf16.vlgmr.msra.gmra.mxu1 %vm99_vm1, %v429_v7  ;;  %s317_s10 = sshll.u32 %s497_s0, 4  ;;  %s318_s10 = int_to_ptr.vmem [resolvable:$true] %s317_s10 }
   0xf   :  { %395 = vmatprep.mubr.msk.bf16.mxu0 %vm99_vm1, %v426_v8  ;;  %403 = vmatprep.mubr.msk.bf16.mxu1 %vm99_vm1, %v430_v9  ;;  %s432_s11 = scalar_lea.vmem %s318_s10, 2048  ;;  %p437_p1 = scmp.lt.s32.totalorder %s318_s10, %s318_s10 }
  0x10   :  { %p433_p0 = scmp.ne.s32.totalorder %s318_s10, %s432_s11  ;;  %p438_p2 = scmp.lt.s32.totalorder %s432_s11, %s432_s11 }
  0x12   :  { %p439_p3 = por %p438_p2, %p437_p1 }
  0x14   :  { %p440_p4 = pnand %p439_p3, %p433_p0 }
  0x16   :  { %396 = vmatmul.mubr.msk.bf16.gmra.mxu0 %vm99_vm1, %v427_v10  ;;  %404 = vmatmul.mubr.msk.bf16.gmra.mxu1 %vm99_vm1, %v431_v11 }
  0xce   :  { %v393_v13 = vpop.f32.mrf.mxu0  ;;  %v568_v14 = vpop.f32.mrf.mxu1 }
  0xcf   :  { %227 = vst [vmem:[#allocation4 + $0x10] sm:$0xff] %v393_v13  ;;  %235 = vst [vmem:[#allocation4 + $0x50] sm:$0xff] %v568_v14  ;;  %v268_v26 = vmul.f32 %v393_v13, %v393_v13 }
  0xd0   :  { %v162_v15 = vpop.f32.mrf.mxu0  ;;  %v571_v16 = vpop.f32.mrf.mxu1 }
  0xd1   :  { %225 = vst [vmem:[#allocation4] sm:$0xff] %v162_v15  ;;  %233 = vst [vmem:[#allocation4 + $0x40] sm:$0xff] %v571_v16  ;;  %v266_v21 = vmul.f32 %v162_v15, %v162_v15 }
  0xd2   :  { %v394_v17 = vpop.f32.mrf.mxu0  ;;  %v574_v18 = vpop.f32.mrf.mxu1 }
  0xd3   :  { %228 = vst [vmem:[#allocation4 + $0x18] sm:$0xff] %v394_v17  ;;  %236 = vst [vmem:[#allocation4 + $0x58] sm:$0xff] %v574_v18  ;;  %v269_v31 = vmul.f32 %v394_v17, %v394_v17 }
  0xd4   :  { %v165_v19 = vpop.f32.mrf.mxu0  ;;  %v197_v20 = vpop.f32.mrf.mxu1 }
  0xd5   :  { %226 = vst [vmem:[#allocation4 + $0x8] sm:$0xff] %v165_v19  ;;  %v242_v22 = vadd.f32 %v165_v19, %v162_v15  ;;  %v267_v23 = vmul.f32 %v165_v19, %v165_v19  ;;  %234 = vst [vmem:[#allocation4 + $0x48] sm:$0xff] %v197_v20 }
  0xd6   :  { %v397_v24 = vpop.f32.mrf.mxu0  ;;  %v577_v25 = vpop.f32.mrf.mxu1 }
  0xd7   :  { %v243_v27 = vadd.f32 %v393_v13, %v242_v22  ;;  %v282_v28 = vadd.f32 %v267_v23, %v266_v21  ;;  %231 = vst [vmem:[#allocation4 + $0x30] sm:$0xff] %v397_v24  ;;  %239 = vst [vmem:[#allocation4 + $0x70] sm:$0xff] %v577_v25 }
  0xd8   :  { %v178_v29 = vpop.f32.mrf.mxu0  ;;  %v210_v30 = vpop.f32.mrf.mxu1 }
  0xd9   :  { %v283_v32 = vadd.f32 %v282_v28, %v268_v26  ;;  %229 = vst [vmem:[#allocation4 + $0x20] sm:$0xff] %v178_v29  ;;  %v244_v33 = vadd.f32 %v394_v17, %v243_v27  ;;  %237 = vst [vmem:[#allocation4 + $0x60] sm:$0xff] %v210_v30  ;;  %v270_v37 = vmul.f32 %v178_v29, %v178_v29 }
  0xda   :  { %v398_v34 = vpop.f32.mrf.mxu0  ;;  %v406_v35 = vpop.f32.mrf.mxu1 }
  0xdb   :  { %v245_v36 = vadd.f32 %v244_v33, %v178_v29  ;;  %v284_v38 = vadd.f32 %v283_v32, %v269_v31  ;;  %232 = vst [vmem:[#allocation4 + $0x38] sm:$0xff] %v398_v34  ;;  %240 = vst [vmem:[#allocation4 + $0x78] sm:$0xff] %v406_v35 }
  0xdc   :  { %v181_v39 = vpop.f32.mrf.mxu0  ;;  %v213_v40 = vpop.f32.mrf.mxu1 }
  0xdd   :  { %v285_v41 = vadd.f32 %v284_v38, %v270_v37  ;;  %230 = vst [vmem:[#allocation4 + $0x28] sm:$0xff] %v181_v39  ;;  %v246_v42 = vadd.f32 %v245_v36, %v181_v39  ;;  %v271_v43 = vmul.f32 %v181_v39, %v181_v39  ;;  %238 = vst [vmem:[#allocation4 + $0x68] sm:$0xff] %v213_v40 }
  0xde   :  { %443 = shalt.err (!%p440_p4)
}
  0xdf   :  { %s498_s12 = smov 128   ;;  %s499_s13 = smov 8   ;;  %v272_v44 = vmul.f32 %v397_v24, %v397_v24  ;;  %v247_v45 = vadd.f32 %v397_v24, %v246_v42  ;;  %v286_v46 = vadd.f32 %v285_v41, %v271_v43  ;;  %v273_v47 = vmul.f32 %v398_v34, %v398_v34  ;;  %v265_v23 = vld [vmem:[#allocation3] sm:$0x1] }
  0xe0   :  { %323 = dma.vmem_to_hbm [thread:$0]  %s318_s10, 2048, %s603_s2, [#allocation5], %s498_s12, %s498_s12, %s499_s13   ;;  %v274_v50 = vmul.f32 %v571_v16, %v571_v16  ;;  %v275_v54 = vmul.f32 %v197_v20, %v197_v20  ;;  %v276_v56 = vmul.f32 %v568_v14, %v568_v14  ;;  %v277_v59 = vmul.f32 %v574_v18, %v574_v18 }
  0xe1   :  { %v248_v48 = vadd.f32 %v398_v34, %v247_v45  ;;  %v287_v49 = vadd.f32 %v286_v46, %v272_v44  ;;  %v278_v63 = vmul.f32 %v210_v30, %v210_v30  ;;  %v279_v3 = vmul.f32 %v213_v40, %v213_v40  ;;  %s500_s2 = smov [#allocation6]   ;;  %s501_s17 = smov [#allocation8]  }
  0xe2   :  { %v280_v4 = vmul.f32 %v577_v25, %v577_v25  ;;  %v281_v7 = vmul.f32 %v406_v35, %v406_v35  ;;  %s330_s16 = sshll.u32 %s500_s2, 4  ;;  %s340_s18 = sshll.u32 %s501_s17, 4  ;;  %s331_s16 = int_to_ptr.vmem [resolvable:$true] %s330_s16  ;;  %s341_s18 = int_to_ptr.vmem [resolvable:$true] %s340_s18 }
  0xe3   :  { %v288_v51 = vadd.f32 %v287_v49, %v273_v47  ;;  %v249_v52 = vadd.f32 %v248_v48, %v571_v16  ;;  %s452_s19 = scalar_lea.vmem %s331_s16, 16  ;;  %s456_s20 = scalar_lea.vmem %s331_s16, 32 }
  0xe4   :  { %p453_p5 = scmp.ne.s32.totalorder %s331_s16, %s452_s19  ;;  %p457_p6 = scmp.lt.s32.totalorder %s331_s16, %s331_s16 }
  0xe5   :  { %v250_v53 = vadd.f32 %v249_v52, %v197_v20  ;;  %v289_v55 = vadd.f32 %v288_v51, %v274_v50  ;;  %v241_v20 = vld [vmem:[#allocation2] sm:$0x1]  ;;  %p458_p7 = scmp.lt.s32.totalorder %s456_s20, %s452_s19 }
  0xe7   :  { %v251_v57 = vadd.f32 %v568_v14, %v250_v53  ;;  %v290_v58 = vadd.f32 %v289_v55, %v275_v54  ;;  %p459_p8 = por %p458_p7, %p457_p6 }
  0xe9   :  { %v291_v60 = vadd.f32 %v290_v58, %v276_v56  ;;  %v252_v61 = vadd.f32 %v574_v18, %v251_v57  ;;  %p460_p9 = pnand %p459_p8, %p453_p5 }
  0xeb   :  { %v253_v62 = vadd.f32 %v252_v61, %v210_v30  ;;  %v292_v0 = vadd.f32 %v291_v60, %v277_v59 }
  0xed   :  { %v293_v1 = vadd.f32 %v292_v0, %v278_v63  ;;  %v254_v2 = vadd.f32 %v253_v62, %v213_v40 }
  0xef   :  { %v255_v5 = vadd.f32 %v577_v25, %v254_v2  ;;  %v294_v6 = vadd.f32 %v293_v1, %v279_v3 }
  0xf1   :  { %v256_v8 = vadd.f32 %v406_v35, %v255_v5  ;;  %v295_v9 = vadd.f32 %v294_v6, %v280_v4 }
  0xf3   :  { %v257_v10 = vrot.slane %v256_v8, 4  ;;  %v296_v11 = vadd.f32 %v295_v9, %v281_v7 }
  0xf5   :  { %v258_v12 = vadd.f32 %v257_v10, %v256_v8  ;;  %v297_v13 = vrot.slane %v296_v11, 4 }
  0xf7   :  { %v259_v14 = vrot.slane %v258_v12, 2  ;;  %v298_v15 = vadd.f32 %v297_v13, %v296_v11 }
  0xf9   :  { %v260_v16 = vadd.f32 %v259_v14, %v258_v12  ;;  %v299_v17 = vrot.slane %v298_v15, 2 }
  0xfb   :  { %v261_v18 = vrot.slane %v260_v16, 1  ;;  %v300_v19 = vadd.f32 %v299_v17, %v298_v15 }
  0xfd   :  { %v262_v21 = vadd.f32 %v261_v18, %v260_v16  ;;  %v301_v22 = vrot.slane %v300_v19, 1 }
  0xff   :  { %v263_v24 = vadd.f32 %v262_v21, %v241_v20  ;;  %v302_v25 = vadd.f32 %v301_v22, %v300_v19 }
 0x101   :  { %264 = vst [vmem:[#allocation2] sm:$0x1] %v263_v24  ;;  %v303_v26 = vadd.f32 %v302_v25, %v265_v23 }
 0x103   :  { %304 = vst [vmem:[#allocation3] sm:$0x1] %v303_v26 }
 0x108   :  { %v308_v27 = vld [vmem:[#allocation2] sm:$0x1] }
 0x109   :  { %309 = vst [vmem:[#allocation6] sm:$0x1] %v308_v27 }
 0x10a   :  { %463 = shalt.err (!%p460_p9)
}
 0x10b   :  { %333 = dma.vmem_to_hbm [thread:$0]  %s331_s16, 16, %s604_s3, [#allocation7]   ;;  %v310_v28 = vld [vmem:[#allocation3] sm:$0x1] }
 0x10c   :  { %311 = vst [vmem:[#allocation8] sm:$0x1] %v310_v28  ;;  %s472_s23 = scalar_lea.vmem %s341_s18, 16  ;;  %s476_s24 = scalar_lea.vmem %s341_s18, 32 }
 0x10d   :  { %p473_p10 = scmp.ne.s32.totalorder %s341_s18, %s472_s23  ;;  %p477_p11 = scmp.lt.s32.totalorder %s341_s18, %s341_s18 }
 0x10e   :  { %p478_p12 = scmp.lt.s32.totalorder %s476_s24, %s472_s23 }
 0x110   :  { %p479_p13 = por %p478_p12, %p477_p11 }
 0x112   :  { %p480_p0 = pnand %p479_p13, %p473_p10 }
 0x114   :  { %483 = shalt.err (!%p480_p0)
}
 0x115   :  { %343 = dma.vmem_to_hbm [thread:$0]  %s341_s18, 16, %s605_s4, [#allocation7]  }
 0x116   :  { %492 = dma.done.wait [#allocation5], 2048  }
 0x117   :  { %493 = vsyncadd [#allocation5], 4294965248 }
 0x118   :  { %494 = dma.done.wait [#allocation7], 32  }
 0x119   :  { %495 = vsyncadd [#allocation7], 4294967264 }
 0x11a   :  { %353 = vsyncpa [#allocation5], 1 }
 0x11b   :  { %354 = vsyncpa [#allocation7], 1 }

</bundles_post_ra>
